<compile_context>
chip_gen: v5e
topology: v5e:2x2
jax: 0.10.0
libtpu: 0.0.40
codegen_flags: <defaults>
</compile_context>

<pallas_src>
import math
import functools

import jax
import jax.numpy as jnp
from jax.experimental import pallas as pl
from jax.experimental.pallas import tpu as pltpu


def _round_up(a, b):
    return -(-a // b) * b


def _round_down(a, b):
    return (a // b) * b


def _auto_vmem_limit():
    """Per-generation VMEM budget: ~3/4 of physical capacity, capped at 112 MiB."""
    cap = 64 * 1024 * 1024  # conservative fallback (v7x: 64 MiB per TensorCore)
    try:
        info = pltpu.get_tpu_info()
        cap = int(getattr(info, "vmem_capacity_bytes", cap)) or cap
    except Exception:
        pass
    return max(32 * 1024 * 1024, min((cap * 3) // 4, 112 * 1024 * 1024))


# -----------------------------------------------------------------------------
# Pass 1: support = X @ W   (row tiles x feature tiles; weight block resident)
# -----------------------------------------------------------------------------
def _support_kernel(x_ref, w_ref, o_ref):
    o_ref[...] = jnp.dot(
        x_ref[...], w_ref[...], preferred_element_type=jnp.float32
    ).astype(o_ref.dtype)


# -----------------------------------------------------------------------------
# Pass 2: out = adj @ support (+ bias)
# grid = (row tiles i, reduction tiles k). The f32 output block is revisited
# across k (out index (i, 0)) and is used directly as the accumulator.
# -----------------------------------------------------------------------------
def _adj_accumulate(adj_ref, sup_ref, o_ref, *, tk, n_valid, mask_cols,
                    resident_support):
    k = pl.program_id(1)

    @pl.when(k == 0)
    def _():
        o_ref[...] = jnp.zeros_like(o_ref)

    a = adj_ref[...]
    if mask_cols:
        # Reduction tail: columns >= n_valid of the (unpadded) adj block are
        # out-of-bounds garbage -> zero them so they cannot contaminate the sum.
        col = jax.lax.broadcasted_iota(jnp.int32, a.shape, 1)
        a = jnp.where(col < (n_valid - k * tk), a, jnp.zeros_like(a))

    if resident_support:
        off = pl.multiple_of(k * tk, tk)
        s = sup_ref[pl.ds(off, tk), :]
    else:
        s = sup_ref[...]

    o_ref[...] += jnp.dot(a, s, preferred_element_type=jnp.float32)


def _adj_kernel_bias(adj_ref, sup_ref, b_ref, o_ref, **kw):
    _adj_accumulate(adj_ref, sup_ref, o_ref, **kw)

    @pl.when(pl.program_id(1) == pl.num_programs(1) - 1)
    def _():
        o_ref[...] += b_ref[...]


def _adj_kernel_nobias(adj_ref, sup_ref, o_ref, **kw):
    _adj_accumulate(adj_ref, sup_ref, o_ref, **kw)


# -----------------------------------------------------------------------------
# Wrapper
# -----------------------------------------------------------------------------
def _gcn_forward(x, adj, weight, bias, matmul_dtype, vmem_limit_bytes, use_hints):
    N, f_in = x.shape
    f_out = weight.shape[1]
    f_pad = _round_up(f_out, 128)  # lane-dense output stores (no masked vst)

    compute_dtype = (jnp.dtype(matmul_dtype) if matmul_dtype is not None
                     else jnp.dtype(x.dtype))
    itm = compute_dtype.itemsize
    vmem_limit = int(vmem_limit_bytes) if vmem_limit_bytes else _auto_vmem_limit()

    # ---- pass-2 tile selection ------------------------------------------------
    # Reduction tile tk: large (multi-MiB adj tiles, HBM-bound), multiple of 128
    # lanes, never larger than N (the ragged tail is masked in-kernel).
    if N < 128:
        tk = N                                  # full-dim block, no column mask
    else:
        tk = min(2048 if itm <= 2 else 1024, _round_down(N, 128))
    num_k = -(-N // tk)
    n_sup = num_k * tk                          # support rows (>= N, zero padded)
    mask_cols = (N % tk) != 0

    # Row tile tm: large for big graphs; for small graphs split into >= 2 tiles
    # so the "parallel" row axis feeds both v7x TensorCores.
    if N <= 8:
        tm = N
    elif N <= 1024:
        tm = min(_round_up(-(-N // 2), 8), _round_down(N, 8))
    else:
        tm = 512
    num_i = -(-N // tm)

    # ---- cheap pads / casts (the O(N^2) adjacency is never padded) ------------
    adj_c = adj if adj.dtype == compute_dtype else adj.astype(compute_dtype)
    x_c = x if x.dtype == compute_dtype else x.astype(compute_dtype)
    x_p = jnp.pad(x_c, ((0, n_sup - N), (0, 0))) if n_sup != N else x_c
    w_p = jnp.pad(weight.astype(compute_dtype), ((0, 0), (0, f_pad - f_out)))

    resident_hint = {"pipeline_mode": pl.Buffered(1)} if use_hints else {}
    stream_hint = {"pipeline_mode": pl.Buffered(3)} if use_hints else {}

    # ---- pass 1: support = X @ W ----------------------------------------------
    tf = f_pad
    w_budget = vmem_limit // 4
    if f_in * tf * itm > w_budget:              # v7x guard: tile f_out if weight is huge
        tf = max(128, _round_down(w_budget // (f_in * itm), 128))
    num_j = -(-f_pad // tf)
    tm1 = 512 if (n_sup >= 512 and n_sup % 512 == 0) else min(tk, n_sup)
    w_hint = resident_hint if num_j == 1 else {}

    support = pl.pallas_call(
        _support_kernel,
        out_shape=jax.ShapeDtypeStruct((n_sup, f_pad), compute_dtype),
        grid=(n_sup // tm1, num_j),
        in_specs=[
            pl.BlockSpec((tm1, f_in), lambda i, j: (i, 0)),
            pl.BlockSpec((f_in, tf), lambda i, j: (0, j), **w_hint),
        ],
        out_specs=pl.BlockSpec((tm1, tf), lambda i, j: (i, j)),
        compiler_params=pltpu.CompilerParams(
            dimension_semantics=("parallel", "parallel"),
            vmem_limit_bytes=vmem_limit,
        ),
        cost_estimate=pl.CostEstimate(
            flops=2 * n_sup * f_in * f_pad,
            transcendentals=0,
            bytes_accessed=(x_p.size + w_p.size + n_sup * f_pad) * itm,
        ),
    )(x_p, w_p)
    # TODO(synk): a huge f_in would additionally need a K-reduction grid axis here.

    # ---- pass 2: out = adj @ support (+ bias) ----------------------------------
    adj_bufs = 3 if use_hints else 2
    sup_bufs = 1 if use_hints else 2
    fixed_vmem = (adj_bufs * tm * tk * itm          # streamed adj tiles
                  + 2 * tm * f_pad * 4              # double-buffered f32 output block
                  + 2 * f_pad * 4                   # bias
                  + (8 << 20))                      # slack for Mosaic internals
    resident = sup_bufs * n_sup * f_pad * itm <= max(vmem_limit - fixed_vmem, 0)

    adj_spec = pl.BlockSpec((tm, tk), lambda i, k: (i, k), **stream_hint)
    if resident:
        sup_spec = pl.BlockSpec((n_sup, f_pad), lambda i, k: (0, 0), **resident_hint)
    else:
        # v7x guard: support too big to stay resident -> stream (tk, f_pad) blocks.
        sup_spec = pl.BlockSpec((tk, f_pad), lambda i, k: (k, 0))
    out_spec = pl.BlockSpec((tm, f_pad), lambda i, k: (i, 0))

    kern_kw = dict(tk=tk, n_valid=N, mask_cols=mask_cols, resident_support=resident)
    cost2 = pl.CostEstimate(
        flops=2 * N * n_sup * f_pad,
        transcendentals=0,
        bytes_accessed=(N * N * itm
                        + (1 if resident else num_i) * n_sup * f_pad * itm
                        + N * f_pad * 4),
    )
    cparams2 = pltpu.CompilerParams(
        dimension_semantics=("parallel", "arbitrary"),
        vmem_limit_bytes=vmem_limit,
    )

    if bias is not None:
        b_p = jnp.pad(bias.astype(jnp.float32), (0, f_pad - f_out)).reshape(1, f_pad)
        out = pl.pallas_call(
            functools.partial(_adj_kernel_bias, **kern_kw),
            out_shape=jax.ShapeDtypeStruct((N, f_pad), jnp.float32),
            grid=(num_i, num_k),
            in_specs=[adj_spec, sup_spec,
                      pl.BlockSpec((1, f_pad), lambda i, k: (0, 0), **resident_hint)],
            out_specs=out_spec,
            compiler_params=cparams2,
            cost_estimate=cost2,
        )(adj_c, support, b_p)
    else:
        out = pl.pallas_call(
            functools.partial(_adj_kernel_nobias, **kern_kw),
            out_shape=jax.ShapeDtypeStruct((N, f_pad), jnp.float32),
            grid=(num_i, num_k),
            in_specs=[adj_spec, sup_spec],
            out_specs=out_spec,
            compiler_params=cparams2,
            cost_estimate=cost2,
        )(adj_c, support)

    # TODO(synk): for genuinely sparse adjacency (torch.spmm), stream only the
    # nonzero column blocks via PrefetchScalarGridSpec instead of dense adj.
    return out[:, :f_out] if f_pad != f_out else out


def graph_convolution(x, adj, weight, bias=None, *, matmul_dtype=None,
                      vmem_limit_bytes=None):
    """GCN layer forward: adj @ (x @ weight) (+ bias).

    matmul_dtype=jnp.bfloat16 halves HBM traffic on the N^2 adjacency stream
    (accumulation stays f32) at the cost of a rounded intermediate (~1e-3 rel.
    error); the default (None) keeps exact float32 PyTorch semantics.
    """
    try:
        return _gcn_forward(x, adj, weight, bias, matmul_dtype,
                            vmem_limit_bytes, use_hints=True)
    except Exception:
        # Fallback without pipeline_mode buffer-count hints (older jaxlibs).
        return _gcn_forward(x, adj, weight, bias, matmul_dtype,
                            vmem_limit_bytes, use_hints=False)


def init_gcn_params(key, in_features, out_features, bias=True):
    """Matches PyTorch reset_parameters(): uniform(-stdv, stdv), stdv = 1/sqrt(out)."""
    stdv = 1.0 / math.sqrt(out_features)
    kw, kb = jax.random.split(key)
    weight = jax.random.uniform(
        kw, (in_features, out_features), dtype=jnp.float32, minval=-stdv, maxval=stdv
    )
    b = (
        jax.random.uniform(kb, (out_features,), dtype=jnp.float32,
                           minval=-stdv, maxval=stdv)
        if bias
        else None
    )
    return weight, b


if __name__ == "__main__":
    key = jax.random.PRNGKey(0)
    (k_x, k_adj, k_p,
     k_x2, k_adj2, k_p2,
     k_x3, k_adj3, k_p3) = jax.random.split(key, 9)

    def make_adj(k, n):
        a = (jax.random.uniform(k, (n, n)) < 0.3).astype(jnp.float32)
        a = jnp.maximum(a, a.T) + jnp.eye(n, dtype=jnp.float32)
        return a / jnp.sum(a, axis=1, keepdims=True)

    # --- main check: small GCN layer (N=16 nodes, 32 -> 8 features, bias) -------
    N, f_in, f_out = 16, 32, 8
    x = jax.random.normal(k_x, (N, f_in), dtype=jnp.float32)
    adj = make_adj(k_adj, N)
    weight, bias = init_gcn_params(k_p, f_in, f_out, bias=True)

    out = jax.block_until_ready(graph_convolution(x, adj, weight, bias))
    ref = adj @ (x @ weight) + bias[None, :]
    assert out.shape == (N, f_out)
    assert jnp.allclose(out, ref, atol=1e-4, rtol=1e-4)

    # --- ragged case: exercises the unpadded-adj path (row overhang, masked
    #     reduction tail, multi-tile K accumulation, f_out > 128) ----------------
    N2, f_in2, f_out2 = 200, 48, 160
    x2 = jax.random.normal(k_x2, (N2, f_in2), dtype=jnp.float32)
    adj2 = make_adj(k_adj2, N2)
    w2, b2 = init_gcn_params(k_p2, f_in2, f_out2, bias=True)
    out2 = jax.block_until_ready(graph_convolution(x2, adj2, w2, b2))
    ref2 = adj2 @ (x2 @ w2) + b2[None, :]
    assert out2.shape == (N2, f_out2)
    assert jnp.allclose(out2, ref2, atol=2e-4, rtol=2e-4)

    # --- bias=None path ----------------------------------------------------------
    N3, f_in3, f_out3 = 50, 20, 12
    x3 = jax.random.normal(k_x3, (N3, f_in3), dtype=jnp.float32)
    adj3 = make_adj(k_adj3, N3)
    w3, _ = init_gcn_params(k_p3, f_in3, f_out3, bias=False)
    out3 = jax.block_until_ready(graph_convolution(x3, adj3, w3, None))
    ref3 = adj3 @ (x3 @ w3)
    assert jnp.allclose(out3, ref3, atol=1e-4, rtol=1e-4)

    # --- optional bf16 adjacency stream (f32 accumulation, looser tolerance) -----
    out_bf = jax.block_until_ready(
        graph_convolution(x2, adj2, w2, b2, matmul_dtype=jnp.bfloat16))
    assert jnp.allclose(out_bf, ref2, atol=5e-2, rtol=5e-2)

    print("KERNEL_OK")
</pallas_src>

<mosaic_0001>
module attributes {stable_mosaic.version = 11 : i64} {
  func.func @_support_kernel(%arg0: i32, %arg1: i32, %arg2: memref<16x32xf32, #tpu.memory_space<vmem>>, %arg3: memref<32x128xf32, #tpu.memory_space<vmem>>, %arg4: memref<16x128xf32, #tpu.memory_space<vmem>>) attributes {dimension_semantics = [#tpu.dimension_semantics<parallel>, #tpu.dimension_semantics<parallel>], iteration_bounds = array<i64: 1, 1>, scalar_prefetch = 0 : i64, scratch_operands = 0 : i64, tpu.core_type = #tpu.core_type<tc>, window_params = [{transform_indices = @transform_0, window_bounds = array<i64: 16, 32>}, {pipeline_mode = #tpu.pipeline_mode<synchronous>, transform_indices = @transform_1, window_bounds = array<i64: 32, 128>}, {transform_indices = @transform_2, window_bounds = array<i64: 16, 128>}]} {
    %c0 = arith.constant 0 : index
    %c0_0 = arith.constant 0 : index
    %0 = vector.load %arg2[%c0, %c0_0] : memref<16x32xf32, #tpu.memory_space<vmem>>, vector<16x32xf32>
    %c0_1 = arith.constant 0 : index
    %c0_2 = arith.constant 0 : index
    %1 = vector.load %arg3[%c0_1, %c0_2] : memref<32x128xf32, #tpu.memory_space<vmem>>, vector<32x128xf32>
    %cst = arith.constant dense<0.000000e+00> : vector<16x128xf32>
    %2 = tpu.matmul %0, %1, %cst {dimension_numbers = #tpu.dot_dimension_numbers<[1], [0], [0], [1], [0, 0, 1, 1], [], []>} : vector<16x32xf32>, vector<32x128xf32>, vector<16x128xf32> -> vector<16x128xf32>
    %c0_3 = arith.constant 0 : index
    %c0_4 = arith.constant 0 : index
    %3 = vector.load %arg4[%c0_3, %c0_4] : memref<16x128xf32, #tpu.memory_space<vmem>>, vector<16x128xf32>
    tpu.vector_store %arg4[%c0_3, %c0_4], %2 {strides = array<i32>} : memref<16x128xf32, #tpu.memory_space<vmem>>, vector<16x128xf32>,
    return
  }
  func.func @transform_0(%arg0: i32, %arg1: i32) -> (i32, i32) {
    %c0_i32 = arith.constant 0 : i32
    %c0_i32_0 = arith.constant 0 : i32
    return %arg0, %c0_i32 : i32, i32
  }
  func.func @transform_1(%arg0: i32, %arg1: i32) -> (i32, i32) {
    %c0_i32 = arith.constant 0 : i32
    %c0_i32_0 = arith.constant 0 : i32
    return %c0_i32, %arg1 : i32, i32
  }
  func.func @transform_2(%arg0: i32, %arg1: i32) -> (i32, i32) {
    %c0_i32 = arith.constant 0 : i32
    return %arg0, %arg1 : i32, i32
  }
}

module attributes {stable_mosaic.version = 11 : i64} {
  func.func @_support_kernel(%arg0: i32, %arg1: i32, %arg2: memref<16x32xf32, #tpu.memory_space<vmem>>, %arg3: memref<32x128xf32, #tpu.memory_space<vmem>>, %arg4: memref<16x128xf32, #tpu.memory_space<vmem>>) attributes {dimension_semantics = [#tpu.dimension_semantics<parallel>, #tpu.dimension_semantics<parallel>], iteration_bounds = array<i64: 1, 1>, scalar_prefetch = 0 : i64, scratch_operands = 0 : i64, tpu.core_type = #tpu.core_type<tc>, window_params = [{transform_indices = @transform_0, window_bounds = array<i64: 16, 32>}, {transform_indices = @transform_1, window_bounds = array<i64: 32, 128>}, {transform_indices = @transform_2, window_bounds = array<i64: 16, 128>}]} {
    %c0 = arith.constant 0 : index
    %c0_0 = arith.constant 0 : index
    %0 = vector.load %arg2[%c0, %c0_0] : memref<16x32xf32, #tpu.memory_space<vmem>>, vector<16x32xf32>
    %c0_1 = arith.constant 0 : index
    %c0_2 = arith.constant 0 : index
    %1 = vector.load %arg3[%c0_1, %c0_2] : memref<32x128xf32, #tpu.memory_space<vmem>>, vector<32x128xf32>
    %cst = arith.constant dense<0.000000e+00> : vector<16x128xf32>
    %2 = tpu.matmul %0, %1, %cst {dimension_numbers = #tpu.dot_dimension_numbers<[1], [0], [0], [1], [0, 0, 1, 1], [], []>} : vector<16x32xf32>, vector<32x128xf32>, vector<16x128xf32> -> vector<16x128xf32>
    %c0_3 = arith.constant 0 : index
    %c0_4 = arith.constant 0 : index
    %3 = vector.load %arg4[%c0_3, %c0_4] : memref<16x128xf32, #tpu.memory_space<vmem>>, vector<16x128xf32>
    tpu.vector_store %arg4[%c0_3, %c0_4], %2 {strides = array<i32>} : memref<16x128xf32, #tpu.memory_space<vmem>>, vector<16x128xf32>,
    return
  }
  func.func @transform_0(%arg0: i32, %arg1: i32) -> (i32, i32) {
    %c0_i32 = arith.constant 0 : i32
    %c0_i32_0 = arith.constant 0 : i32
    return %arg0, %c0_i32 : i32, i32
  }
  func.func @transform_1(%arg0: i32, %arg1: i32) -> (i32, i32) {
    %c0_i32 = arith.constant 0 : i32
    %c0_i32_0 = arith.constant 0 : i32
    return %c0_i32, %arg1 : i32, i32
  }
  func.func @transform_2(%arg0: i32, %arg1: i32) -> (i32, i32) {
    %c0_i32 = arith.constant 0 : i32
    return %arg0, %arg1 : i32, i32
  }
}

</mosaic_0001>

<bundles_post_ra>
// kernel: tpu_custom_call.1
= control target key start
LH: loop header
LB: loop body
LE: loop exit
PB: predicated region body
PF: predicated region fallthrough
CT: control target
= control target key end

     0   :  { %7 = vsyncpa [#allocation3], 0  ;;  %s229_s0 = inlined_call_operand.hbm [shape: f32[16,32], index: 0, kind: input, shape index: {}]   ;;  %s230_s1 = inlined_call_operand.hbm [shape: f32[32,128], index: 1, kind: input, shape index: {}]   ;;  %s231_s2 = inlined_call_operand.hbm [shape: f32[16,128], index: 2, kind: output, shape index: {}]  }
   0x1   :  { %8 = vsyncpa [#allocation6], 0 }
   0x2   :  { %9 = vsyncpa [#allocation4], 0  ;;  %s14_s11 = sshll.u32 %s229_s0, 4  ;;  %s191_s12 = smov [#allocation2]   ;;  %s15_s11 = int_to_ptr.hbm [resolvable:$true] %s14_s11 }
   0x3   :  { %s16_s13 = sshll.u32 %s191_s12, 4  ;;  %s27_s16 = sshll.u32 %s230_s1, 4  ;;  %s17_s13 = int_to_ptr.vmem [resolvable:$true] %s16_s13  ;;  %s28_s16 = int_to_ptr.hbm [resolvable:$true] %s27_s16 }
   0x4   :  { %s192_s17 = smov 128   ;;  %s193_s18 = smov 8  }
   0x5   :  { %22 = dma.hbm_to_vmem [thread:$0]  %s15_s11, 256, %s17_s13, [#allocation3], %s192_s17, %s192_s17, %s193_s18  }
   0x6   :  { %s194_s19 = smov [#allocation5]  }
   0x7   :  { %s29_s20 = sshll.u32 %s194_s19, 4  ;;  %s30_s20 = int_to_ptr.vmem [resolvable:$true] %s29_s20 }
   0x8   :  { %35 = dma.hbm_to_vmem [thread:$0]  %s28_s16, 512, %s30_s20, [#allocation6], %s192_s17, %s192_s17, %s193_s18  }
   0x9   :  { %185 = dma.done.wait [#allocation3], 256  }
   0xa   :  { %186 = vsyncadd [#allocation3], 4294967040 }
   0xb   :  { %187 = dma.done.wait [#allocation6], 512  }
   0xc   :  { %188 = vsyncadd [#allocation6], 4294966784  ;;  %v49_v0 = vld [vmem:[#allocation5 + $0x18] sm:$0xff]  ;;  %v48_v1 = vld [vmem:[#allocation5 + $0x10] sm:$0xff]  ;;  %vm50_vm0 = vcmask 261120   ;;  %s195_s0 = smov [#allocation7]  }
   0xd   :  { %69 = vmatpush.msra.mxu0 %v49_v0  ;;  %104 = vmatpush.msra.mxu1 %v49_v0  ;;  %v47_v2 = vld [vmem:[#allocation5 + $0x8] sm:$0xff]  ;;  %v46_v3 = vld [vmem:[#allocation5] sm:$0xff]  ;;  %v44_v4 = vld [vmem:[#allocation2] sm:$0xff]  ;;  %s86_s1 = sshll.u32 %s195_s0, 4  ;;  %s88_s23 = sshll.u32 %s231_s2, 4  ;;  %s87_s1 = int_to_ptr.vmem [resolvable:$true] %s86_s1  ;;  %s89_s23 = int_to_ptr.hbm [resolvable:$true] %s88_s23 }
   0xe   :  { %v45_v5 = vld [vmem:[#allocation2 + $0x8] sm:$0xff] }
   0xf   :  { %70 = vmatpush.msra.mxu0 %v48_v1  ;;  %105 = vmatpush.msra.mxu1 %v48_v1 }
  0x11   :  { %71 = vmatpush.msra.mxu0 %v47_v2  ;;  %106 = vmatpush.msra.mxu1 %v47_v2 }
  0x13   :  { %72 = vmatpush.msra.mxu0 %v46_v3  ;;  %107 = vmatpush.msra.mxu1 %v46_v3 }
  0x14   :  { %102 = vmatmul.msk.f32.vlgmr.msra.gmra.mxu0 %vm50_vm0, %v44_v4  ;;  %103 = vmatmul.msk.f32.vlgmr.msra.gmra.mxu1 %vm50_vm0, %v45_v5 }
  0x91   :  { %v74_v6 = vpop.f32.mrf.mxu0  ;;  %v77_v7 = vpop.f32.mrf.mxu1 }
  0x92   :  { %80 = vst [vmem:[#allocation7] sm:$0xff] %v74_v6 }
  0x93   :  { %81 = vst [vmem:[#allocation7 + $0x8] sm:$0xff] %v77_v7 }
  0x94   :  { %94 = dma.vmem_to_hbm [thread:$0]  %s87_s1, 256, %s89_s23, [#allocation4], %s192_s17, %s192_s17, %s193_s18  }
  0x95   :  { %189 = dma.done.wait [#allocation4], 256  }
  0x96   :  { %190 = vsyncadd [#allocation4], 4294967040 }
  0x97   :  { %99 = vsyncpa [#allocation3], 1 }
  0x98   :  { %100 = vsyncpa [#allocation6], 1 }
  0x99   :  { %101 = vsyncpa [#allocation4], 1 }

// kernel: tpu_custom_call.1
= control target key start
LH: loop header
LB: loop body
LE: loop exit
PB: predicated region body
PF: predicated region fallthrough
CT: control target
= control target key end

     0   :  { %7 = vsyncpa [#allocation3], 0  ;;  %s229_s0 = inlined_call_operand.hbm [shape: f32[16,32], index: 0, kind: input, shape index: {}]   ;;  %s230_s1 = inlined_call_operand.hbm [shape: f32[32,128], index: 1, kind: input, shape index: {}]   ;;  %s231_s2 = inlined_call_operand.hbm [shape: f32[16,128], index: 2, kind: output, shape index: {}]  }
   0x1   :  { %8 = vsyncpa [#allocation6], 0 }
   0x2   :  { %9 = vsyncpa [#allocation4], 0  ;;  %s14_s11 = sshll.u32 %s229_s0, 4  ;;  %s191_s12 = smov [#allocation2]   ;;  %s15_s11 = int_to_ptr.hbm [resolvable:$true] %s14_s11 }
   0x3   :  { %s16_s13 = sshll.u32 %s191_s12, 4  ;;  %s27_s16 = sshll.u32 %s230_s1, 4  ;;  %s17_s13 = int_to_ptr.vmem [resolvable:$true] %s16_s13  ;;  %s28_s16 = int_to_ptr.hbm [resolvable:$true] %s27_s16 }
   0x4   :  { %s192_s17 = smov 128   ;;  %s193_s18 = smov 8  }
   0x5   :  { %22 = dma.hbm_to_vmem [thread:$0]  %s15_s11, 256, %s17_s13, [#allocation3], %s192_s17, %s192_s17, %s193_s18  }
   0x6   :  { %s194_s19 = smov [#allocation5]  }
   0x7   :  { %s29_s20 = sshll.u32 %s194_s19, 4  ;;  %s30_s20 = int_to_ptr.vmem [resolvable:$true] %s29_s20 }
   0x8   :  { %35 = dma.hbm_to_vmem [thread:$0]  %s28_s16, 512, %s30_s20, [#allocation6], %s192_s17, %s192_s17, %s193_s18  }
   0x9   :  { %185 = dma.done.wait [#allocation3], 256  }
   0xa   :  { %186 = vsyncadd [#allocation3], 4294967040 }
   0xb   :  { %187 = dma.done.wait [#allocation6], 512  }
   0xc   :  { %188 = vsyncadd [#allocation6], 4294966784  ;;  %v49_v0 = vld [vmem:[#allocation5 + $0x18] sm:$0xff]  ;;  %v48_v1 = vld [vmem:[#allocation5 + $0x10] sm:$0xff]  ;;  %vm50_vm0 = vcmask 261120   ;;  %s195_s0 = smov [#allocation7]  }
   0xd   :  { %69 = vmatpush.msra.mxu0 %v49_v0  ;;  %104 = vmatpush.msra.mxu1 %v49_v0  ;;  %v47_v2 = vld [vmem:[#allocation5 + $0x8] sm:$0xff]  ;;  %v46_v3 = vld [vmem:[#allocation5] sm:$0xff]  ;;  %v44_v4 = vld [vmem:[#allocation2] sm:$0xff]  ;;  %s86_s1 = sshll.u32 %s195_s0, 4  ;;  %s88_s23 = sshll.u32 %s231_s2, 4  ;;  %s87_s1 = int_to_ptr.vmem [resolvable:$true] %s86_s1  ;;  %s89_s23 = int_to_ptr.hbm [resolvable:$true] %s88_s23 }
   0xe   :  { %v45_v5 = vld [vmem:[#allocation2 + $0x8] sm:$0xff] }
   0xf   :  { %70 = vmatpush.msra.mxu0 %v48_v1  ;;  %105 = vmatpush.msra.mxu1 %v48_v1 }
  0x11   :  { %71 = vmatpush.msra.mxu0 %v47_v2  ;;  %106 = vmatpush.msra.mxu1 %v47_v2 }
  0x13   :  { %72 = vmatpush.msra.mxu0 %v46_v3  ;;  %107 = vmatpush.msra.mxu1 %v46_v3 }
  0x14   :  { %102 = vmatmul.msk.f32.vlgmr.msra.gmra.mxu0 %vm50_vm0, %v44_v4  ;;  %103 = vmatmul.msk.f32.vlgmr.msra.gmra.mxu1 %vm50_vm0, %v45_v5 }
  0x91   :  { %v74_v6 = vpop.f32.mrf.mxu0  ;;  %v77_v7 = vpop.f32.mrf.mxu1 }
  0x92   :  { %80 = vst [vmem:[#allocation7] sm:$0xff] %v74_v6 }
  0x93   :  { %81 = vst [vmem:[#allocation7 + $0x8] sm:$0xff] %v77_v7 }
  0x94   :  { %94 = dma.vmem_to_hbm [thread:$0]  %s87_s1, 256, %s89_s23, [#allocation4], %s192_s17, %s192_s17, %s193_s18  }
  0x95   :  { %189 = dma.done.wait [#allocation4], 256  }
  0x96   :  { %190 = vsyncadd [#allocation4], 4294967040 }
  0x97   :  { %99 = vsyncpa [#allocation3], 1 }
  0x98   :  { %100 = vsyncpa [#allocation6], 1 }
  0x99   :  { %101 = vsyncpa [#allocation4], 1 }

</bundles_post_ra>
